<compile_context>
chip_gen: v5e
topology: v5e:2x2
jax: 0.10.0
libtpu: 0.0.40
codegen_flags: <defaults>
</compile_context>

<pallas_src>
import jax
import jax.numpy as jnp
from jax import lax
from jax.experimental import pallas as pl
from jax.experimental.pallas import tpu as pltpu


def _residual_kernel(x_ref, halo_ref, w1_ref, w2_ref, o_ref):
    # x_ref   : (1, C_in, TL)    one (batch, L-tile) slab; channels on sublanes, length on lanes
    # halo_ref: (1, 1, C_in, 2)  neighbour columns: [:,0] = x[.., tile_start-1], [:,1] = x[.., tile_end]
    # w1_ref  : (C_hid, 3*C_in)  fused-tap conv1d(k=3) weight (tap-major along columns)
    # w2_ref  : (C_out, C_hid)   conv1d(k=1) weight
    # o_ref   : (1, C_out, TL)
    x = x_ref[0]                                    # (C_in, TL)
    a = jnp.maximum(x, 0.0)                         # ReLU
    halo = jnp.maximum(halo_ref[0, 0], 0.0)         # (C_in, 2), ReLU of neighbour columns

    tl = x.shape[-1]
    col = lax.broadcasted_iota(jnp.int32, a.shape, 1)

    # a_prev[:, l] = a[:, l-1]; column 0 comes from the left halo (zero at sequence start).
    a_prev = pltpu.roll(a, shift=1, axis=1)
    a_prev = jnp.where(col == 0, halo[:, 0:1], a_prev)
    # a_next[:, l] = a[:, l+1]; last column comes from the right halo (zero at sequence end).
    a_next = pltpu.roll(a, shift=tl - 1, axis=1)
    a_next = jnp.where(col == tl - 1, halo[:, 1:2], a_next)

    # Fuse the three taps into a single MXU matmul (K = 3*C_in instead of 3 tiny K=C_in dots).
    rhs = jnp.concatenate([a_prev, a, a_next], axis=0)                    # (3*C_in, TL)
    y = jnp.dot(w1_ref[...], rhs, preferred_element_type=jnp.float32)     # (C_hid, TL) f32

    h = jnp.maximum(y, 0.0).astype(x.dtype)          # ReLU; cast back to input dtype for the MXU
    z = jnp.dot(w2_ref[...], h, preferred_element_type=jnp.float32)       # (C_out, TL) f32

    o_ref[0] = (x.astype(jnp.float32) + z).astype(o_ref.dtype)


def residual_forward(x_ncw, w1, w2, *, max_tile=512):
    """x_ncw: (N, C_in, L) | w1: (C_hid, C_in, 3) torch Conv1d layout | w2: (C_out, C_hid, 1)."""
    N, C_in, L = x_ncw.shape
    C_hid, C_in_w, K = w1.shape
    C_out = w2.shape[0]
    assert K == 3 and C_in_w == C_in
    assert C_out == C_in, "residual add requires num_hiddens == in_channels"
    assert max_tile % 128 == 0

    # Pad L up to a lane-dense multiple of 128 (unmasked vector stores), then tile it.
    lane = 128
    l_pad = ((L + lane - 1) // lane) * lane
    if l_pad <= max_tile:
        tl = l_pad
    else:
        tl = max_tile
        l_pad = ((l_pad + tl - 1) // tl) * tl
    n_l = l_pad // tl

    x_p = jnp.pad(x_ncw, ((0, 0), (0, 0), (0, l_pad - L)))          # (N, C_in, L_pad)

    # One-column halo per (batch, L-tile): column just left of the tile and just right of it.
    x_h = jnp.pad(x_p, ((0, 0), (0, 0), (1, 1)))                    # (N, C_in, L_pad+2)
    left = x_h[:, :, 0:l_pad:tl]                                    # (N, C_in, n_l)
    right = x_h[:, :, tl + 1::tl]                                   # (N, C_in, n_l)
    halo = jnp.transpose(jnp.stack([left, right], axis=-1), (0, 2, 1, 3))   # (N, n_l, C_in, 2)

    # Torch conv weights -> fused matmul layouts (done once, outside the kernel).
    w1_f = jnp.transpose(w1, (0, 2, 1)).reshape(C_hid, 3 * C_in)    # (C_hid, 3*C_in), tap-major cols
    w2_f = w2[:, :, 0]                                              # (C_out, C_hid)

    itemsize = jnp.dtype(x_ncw.dtype).itemsize
    w_itemsize = jnp.dtype(w1.dtype).itemsize
    flops = 2 * N * l_pad * (3 * C_in * C_hid + C_hid * C_out)
    bytes_accessed = itemsize * (x_p.size + N * C_out * l_pad + halo.size) \
        + w_itemsize * (w1_f.size + w2_f.size)

    out_p = pl.pallas_call(
        _residual_kernel,
        out_shape=jax.ShapeDtypeStruct((N, C_out, l_pad), x_ncw.dtype),
        grid_spec=pltpu.PrefetchScalarGridSpec(
            num_scalar_prefetch=0,
            grid=(N, n_l),
            in_specs=[
                pl.BlockSpec((1, C_in, tl), lambda n, l: (n, 0, l)),
                pl.BlockSpec((1, 1, C_in, 2), lambda n, l: (n, l, 0, 0)),
                pl.BlockSpec((C_hid, 3 * C_in), lambda n, l: (0, 0)),
                pl.BlockSpec((C_out, C_hid), lambda n, l: (0, 0)),
            ],
            out_specs=pl.BlockSpec((1, C_out, tl), lambda n, l: (n, 0, l)),
        ),
        compiler_params=pltpu.CompilerParams(
            dimension_semantics=("parallel", "parallel"),
            vmem_limit_bytes=48 * 1024 * 1024,
        ),
        cost_estimate=pl.CostEstimate(
            flops=int(flops), transcendentals=0, bytes_accessed=int(bytes_accessed)),
    )(x_p, halo, w1_f, w2_f)

    return out_p[:, :, :L]


def residual_reference(x_ncw, w1, w2):
    """Plain-JAX reference mirroring the PyTorch module (NCW conv1d), f32-exact."""
    a = jnp.maximum(x_ncw, 0.0)
    dn = lax.conv_dimension_numbers(x_ncw.shape, w1.shape, ("NCH", "OIH", "NCH"))
    y = lax.conv_general_dilated(a, w1, window_strides=(1,), padding=((1, 1),),
                                 dimension_numbers=dn, precision=lax.Precision.HIGHEST)
    h = jnp.maximum(y, 0.0)
    z = lax.conv_general_dilated(h, w2, window_strides=(1,), padding=((0, 0),),
                                 dimension_numbers=dn, precision=lax.Precision.HIGHEST)
    return x_ncw + z


if __name__ == "__main__":
    def run_case(key, n, c_in, c_hid, l, max_tile=512):
        kx, k1, k2 = jax.random.split(key, 3)
        x = jax.random.normal(kx, (n, c_in, l), dtype=jnp.float32)
        # torch Conv1d layout (out_ch, in_ch, k), no bias (matches the module).
        w1 = 0.1 * jax.random.normal(k1, (c_hid, c_in, 3), dtype=jnp.float32)
        w2 = 0.1 * jax.random.normal(k2, (c_in, c_hid, 1), dtype=jnp.float32)
        out = jax.block_until_ready(residual_forward(x, w1, w2, max_tile=max_tile))
        ref = residual_reference(x, w1, w2)
        assert out.shape == ref.shape == (n, c_in, l)
        assert jnp.allclose(out, ref, atol=1e-5, rtol=1e-5), "mismatch vs reference"

    key = jax.random.PRNGKey(0)
    k1, k2 = jax.random.split(key)
    # Shapes implied by the module (in_channels == num_hiddens for the residual add).
    run_case(k1, n=2, c_in=8, c_hid=16, l=16)
    # Exercise the L-tiling + halo path: 3 tiles of 128 lanes.
    run_case(k2, n=2, c_in=16, c_hid=32, l=300, max_tile=128)

    print("KERNEL_OK")
</pallas_src>

<mosaic_0001>
module attributes {stable_mosaic.version = 11 : i64} {
  func.func @_residual_kernel(%arg0: i32, %arg1: i32, %arg2: memref<1x8x128xf32, #tpu.memory_space<vmem>>, %arg3: memref<1x1x8x2xf32, #tpu.memory_space<vmem>>, %arg4: memref<16x24xf32, #tpu.memory_space<vmem>>, %arg5: memref<8x16xf32, #tpu.memory_space<vmem>>, %arg6: memref<1x8x128xf32, #tpu.memory_space<vmem>>) attributes {dimension_semantics = [#tpu.dimension_semantics<parallel>, #tpu.dimension_semantics<parallel>], iteration_bounds = array<i64: 2, 1>, scalar_prefetch = 0 : i64, scratch_operands = 0 : i64, tpu.core_type = #tpu.core_type<tc>, window_params = [{transform_indices = @transform_0, window_bounds = array<i64: 1, 8, 128>}, {transform_indices = @transform_1, window_bounds = array<i64: 1, 1, 8, 2>}, {pipeline_mode = #tpu.pipeline_mode<synchronous>, transform_indices = @transform_2, window_bounds = array<i64: 16, 24>}, {pipeline_mode = #tpu.pipeline_mode<synchronous>, transform_indices = @transform_3, window_bounds = array<i64: 8, 16>}, {transform_indices = @transform_4, window_bounds = array<i64: 1, 8, 128>}]} {
    %c0 = arith.constant 0 : index
    %c0_0 = arith.constant 0 : index
    %c0_1 = arith.constant 0 : index
    %0 = vector.load %arg2[%c0, %c0_0, %c0_1] : memref<1x8x128xf32, #tpu.memory_space<vmem>>, vector<1x8x128xf32>
    %1 = vector.shape_cast %0 : vector<1x8x128xf32> to vector<8x128xf32>
    %cst = arith.constant 0.000000e+00 : f32
    %2 = vector.broadcast %cst : f32 to vector<8x128xf32>
    %3 = arith.maximumf %1, %2 : vector<8x128xf32>
    %c0_2 = arith.constant 0 : index
    %c0_3 = arith.constant 0 : index
    %c0_4 = arith.constant 0 : index
    %c0_5 = arith.constant 0 : index
    %4 = vector.load %arg3[%c0_2, %c0_3, %c0_4, %c0_5] : memref<1x1x8x2xf32, #tpu.memory_space<vmem>>, vector<1x1x8x2xf32>
    %5 = vector.shape_cast %4 : vector<1x1x8x2xf32> to vector<8x2xf32>
    %cst_6 = arith.constant 0.000000e+00 : f32
    %6 = vector.broadcast %cst_6 : f32 to vector<8x2xf32>
    %7 = arith.maximumf %5, %6 : vector<8x2xf32>
    %8 = tpu.iota {dimensions = array<i32: 1>} : vector<8x128xi32>
    %c1_i32 = arith.constant 1 : i32
    %9 = tpu.dynamic_rotate %3 by %c1_i32 dim 1 : vector<8x128xf32>, i32 -> vector<8x128xf32>
    %c0_i32 = arith.constant 0 : i32
    %10 = vector.broadcast %c0_i32 : i32 to vector<8x128xi32>
    %11 = arith.cmpi eq, %8, %10 : vector<8x128xi32>
    %12 = vector.extract_strided_slice %7 {offsets = [0, 0], sizes = [8, 1], strides = [1, 1]} : vector<8x2xf32> to vector<8x1xf32>
    %13 = vector.shape_cast %12 : vector<8x1xf32> to vector<8x1xf32>
    %14 = vector.broadcast %13 : vector<8x1xf32> to vector<8x128xf32>
    %15 = arith.select %11, %14, %9 : vector<8x128xi1>, vector<8x128xf32>
    %c127_i32 = arith.constant 127 : i32
    %16 = tpu.dynamic_rotate %3 by %c127_i32 dim 1 : vector<8x128xf32>, i32 -> vector<8x128xf32>
    %c127_i32_7 = arith.constant 127 : i32
    %17 = vector.broadcast %c127_i32_7 : i32 to vector<8x128xi32>
    %18 = arith.cmpi eq, %8, %17 : vector<8x128xi32>
    %19 = vector.extract_strided_slice %7 {offsets = [0, 1], sizes = [8, 1], strides = [1, 1]} : vector<8x2xf32> to vector<8x1xf32>
    %20 = vector.shape_cast %19 : vector<8x1xf32> to vector<8x1xf32>
    %21 = vector.broadcast %20 : vector<8x1xf32> to vector<8x128xf32>
    %22 = arith.select %18, %21, %16 : vector<8x128xi1>, vector<8x128xf32>
    %23 = tpu.concatenate %15, %3, %22 in 0 : vector<8x128xf32>, vector<8x128xf32>, vector<8x128xf32> -> vector<24x128xf32>
    %c0_8 = arith.constant 0 : index
    %c0_9 = arith.constant 0 : index
    %24 = vector.load %arg4[%c0_8, %c0_9] : memref<16x24xf32, #tpu.memory_space<vmem>>, vector<16x24xf32>
    %cst_10 = arith.constant dense<0.000000e+00> : vector<16x128xf32>
    %25 = tpu.matmul %24, %23, %cst_10 {dimension_numbers = #tpu.dot_dimension_numbers<[1], [0], [0], [1], [0, 0, 1, 1], [], []>} : vector<16x24xf32>, vector<24x128xf32>, vector<16x128xf32> -> vector<16x128xf32>
    %cst_11 = arith.constant 0.000000e+00 : f32
    %26 = vector.broadcast %cst_11 : f32 to vector<16x128xf32>
    %27 = arith.maximumf %25, %26 : vector<16x128xf32>
    %c0_12 = arith.constant 0 : index
    %c0_13 = arith.constant 0 : index
    %28 = vector.load %arg5[%c0_12, %c0_13] : memref<8x16xf32, #tpu.memory_space<vmem>>, vector<8x16xf32>
    %cst_14 = arith.constant dense<0.000000e+00> : vector<8x128xf32>
    %29 = tpu.matmul %28, %27, %cst_14 {dimension_numbers = #tpu.dot_dimension_numbers<[1], [0], [0], [1], [0, 0, 1, 1], [], []>} : vector<8x16xf32>, vector<16x128xf32>, vector<8x128xf32> -> vector<8x128xf32>
    %30 = arith.addf %1, %29 : vector<8x128xf32>
    %c0_15 = arith.constant 0 : index
    %c0_16 = arith.constant 0 : index
    %c0_17 = arith.constant 0 : index
    %31 = vector.load %arg6[%c0_15, %c0_16, %c0_17] : memref<1x8x128xf32, #tpu.memory_space<vmem>>, vector<1x8x128xf32>
    %32 = vector.shape_cast %31 : vector<1x8x128xf32> to vector<8x128xf32>
    %33 = vector.shape_cast %30 : vector<8x128xf32> to vector<1x8x128xf32>
    tpu.vector_store %arg6[%c0_15, %c0_16, %c0_17], %33 {strides = array<i32>} : memref<1x8x128xf32, #tpu.memory_space<vmem>>, vector<1x8x128xf32>,
    return
  }
  func.func @transform_0(%arg0: i32, %arg1: i32) -> (i32, i32, i32) {
    %c0_i32 = arith.constant 0 : i32
    %c0_i32_0 = arith.constant 0 : i32
    return %arg0, %c0_i32, %arg1 : i32, i32, i32
  }
  func.func @transform_1(%arg0: i32, %arg1: i32) -> (i32, i32, i32, i32) {
    %c0_i32 = arith.constant 0 : i32
    %c0_i32_0 = arith.constant 0 : i32
    %c0_i32_1 = arith.constant 0 : i32
    return %arg0, %arg1, %c0_i32, %c0_i32_0 : i32, i32, i32, i32
  }
  func.func @transform_2(%arg0: i32, %arg1: i32) -> (i32, i32) {
    %c0_i32 = arith.constant 0 : i32
    %c0_i32_0 = arith.constant 0 : i32
    %c0_i32_1 = arith.constant 0 : i32
    return %c0_i32, %c0_i32_0 : i32, i32
  }
  func.func @transform_3(%arg0: i32, %arg1: i32) -> (i32, i32) {
    %c0_i32 = arith.constant 0 : i32
    %c0_i32_0 = arith.constant 0 : i32
    %c0_i32_1 = arith.constant 0 : i32
    return %c0_i32, %c0_i32_0 : i32, i32
  }
  func.func @transform_4(%arg0: i32, %arg1: i32) -> (i32, i32, i32) {
    %c0_i32 = arith.constant 0 : i32
    %c0_i32_0 = arith.constant 0 : i32
    return %arg0, %c0_i32, %arg1 : i32, i32, i32
  }
}

</mosaic_0001>

<bundles_post_ra>
// kernel: tpu_custom_call.1
= control target key start
LH: loop header
LB: loop body
LE: loop exit
PB: predicated region body
PF: predicated region fallthrough
CT: control target
= control target key end

     0   :  { %9 = vsyncpa [#allocation3], 0  ;;  %s902_s0 = inlined_call_operand.vmem [shape: f32[2,8,128], index: 0, kind: input, shape index: {}]   ;;  %s903_s1 = inlined_call_operand.vmem [shape: f32[2,1,8,2], index: 1, kind: input, shape index: {}]   ;;  %s904_s2 = inlined_call_operand.hbm [shape: f32[16,24], index: 2, kind: input, shape index: {}]   ;;  %s905_s3 = inlined_call_operand.hbm [shape: f32[8,16], index: 3, kind: input, shape index: {}]   ;;  %s906_s4 = inlined_call_operand.hbm [shape: f32[2,8,128], index: 4, kind: output, shape index: {}]  }
   0x1   :  { %10 = vsyncpa [#allocation6], 0 }
   0x2   :  { %11 = vsyncpa [#allocation4], 0 }
   0x3   :  { %13 = vsyncpa [#allocation4 + $0x1], 0  ;;  %s774_s15 = smov 0   ;;  %s776_s16 = smov 0  }
   0x4   :  { %s778_s17 = smov 0   ;;  %s780_s18 = smov 0  }
   0x5   :  { %s782_s19 = smov 0   ;;  %s784_s20 = smov 0  }
   0x6 LB: > { %s487_s21 = sadd.s32 4294967295, %s739_s20   ;;  %s488_s22 = sadd.s32 4294967294, %s739_s20   ;;  %s739_s20 = sphi %s784_s20, %s19_s20   ;;  %s735_s19 = sphi %s782_s19, %s915_s19   ;;  %s731_s18 = sphi %s780_s18, %s914_s18   ;;  %s727_s17 = sphi %s778_s17, %s913_s17   ;;  %s723_s16 = sphi %s776_s16, %s912_s16   ;;  %s719_s15 = sphi %s774_s15, %s911_s15  }
   0x7   : > { %s31_s23 = sadd.s32 1, %s735_s19  ;;  %s138_s24 = sadd.s32 1, %s727_s17 }
   0x8   : > { %p33_p0 = scmp.ge.s32.totalorder %s31_s23, 2  ;;  %p148_p1 = scmp.ne.s32.totalorder %s727_s17, %s723_s16 }
   0x9   : > { %p149_p2 = scmp.eq.s32.totalorder %s487_s21, 1  ;;  %p154_p3 = scmp.ne.s32.totalorder %s723_s16, %s719_s15 }
   0xa   : > { %s917_s23 = smov (%p33_p0, %s31_s23), 0  ;;  %p155_p5 = scmp.eq.s32.totalorder %s488_s22, 1 }
   0xb   : > { %p814_p4 = por %p149_p2, %p148_p1  ;;  %s133_s26 = ssub.s32 %s735_s19, %s917_s23 }
   0xc   : > { %p489_p6 = scmp.ge.s32.totalorder %s739_s20, 1  ;;  %p136_p7 = scmp.eq.s32.totalorder %s133_s26, 0 }
   0xd   : > { %p821_p8 = por %p155_p5, %p154_p3  ;;  %p162_p9 = scmp.lt.s32.totalorder %s739_s20, 3 }
   0xe   : > { %s827_s28 = scalar_select %p136_p7, %s727_s17, %s138_s24  }
   0xf   : > { %p829_p10 = pnand %p489_p6, %p162_p9  ;;  %p833_p11 = scmp.eq.s32.totalorder %s487_s21, 0 }
  0x10   : > { %s173_s7 = sshll.u32 %s904_s2, 4  ;;  %s741_s8 = smov [#allocation2]   ;;  %s174_s7 = int_to_ptr.hbm [resolvable:$true] %s173_s7 }
  0x11   : > { %p519_p12 = pneg %p829_p10  ;;  %s175_s9 = sshll.u32 %s741_s8, 4  ;;  %s176_s9 = int_to_ptr.vmem [resolvable:$true] %s175_s9 }
  0x12   : > { %s188_s12 = sshll.u32 %s905_s3, 4  ;;  %s742_s13 = smov 128   ;;  %s189_s12 = int_to_ptr.hbm [resolvable:$true] %s188_s12 }
  0x13   : > { %p520_p13 = pnand %p833_p11, %p519_p12  ;;  %s743_s14 = smov 8  }
  0x14   : > { %s744_s21 = smov [#allocation5]   ;;  %223 = sbr.rel (%p829_p10) target bundleno = 434 (0x1b2), region = 36 }
  0x15   : > { %522 = dma.hbm_to_vmem [thread:$0]  (!%p520_p13), %s174_s7, 256, %s176_s9, [#allocation3], %s742_s13, %s742_s13, %s743_s14  }
  0x16   : > { %s190_s22 = sshll.u32 %s744_s21, 4  ;;  %s191_s22 = int_to_ptr.vmem [resolvable:$true] %s190_s22 }
  0x17   : > { %525 = dma.hbm_to_vmem [thread:$0]  (!%p520_p13), %s189_s12, 128, %s191_s22, [#allocation6]  }
  0x19   : > { %706 = dma.done.wait (%p833_p11), [#allocation3], 256  }
  0x1a   : > { %708 = vsyncadd (%p833_p11), [#allocation3], 4294967040 }
  0x1b   : > { %710 = dma.done.wait (%p833_p11), [#allocation6], 128  }
  0x1c   : > { %712 = vsyncadd (%p833_p11), [#allocation6], 4294967168  ;;  %p264_p0 = scmp.lt.s32.totalorder %s731_s18, 1  ;;  %v745_v0 = vmov 1   ;;  %v746_v1 = vmov 0   ;;  %s747_s9 = smov 1   ;;  %v282_v6 = vlaneseq }
  0x1d   : > { %591 = vset.pattern.permute.xlu0 %v745_v0  ;;  %592 = vset.pattern.permute.xlu1 %v746_v1  ;;  %s748_s10 = smov 127   ;;  %v302_v13 = vld [vmem:[#allocation2 + $0x8] sm:$0xff]  ;;  %vm303_vm2 = vcmask 195584   ;;  %v301_v14 = vld [vmem:[#allocation2] sm:$0xff]  ;;  %v335_v20 = vld [vmem:[#allocation5] sm:$0xff]  ;;  %vm336_vm3 = vcmask 130048  }
  0x1e   : > { %s265_s24 = scalar_select %p264_p0, %s731_s18, 1  ;;  %v283_v9 = vand.u32 127, %v282_v6 }
  0x1f   : > { %s261_s11 = sand.u32 1, %s723_s16   ;;  %s503_s13 = sshll.u32 %s731_s18, 3 }
  0x20   : > { %s497_s26 = sshll.u32 %s265_s24, 3  ;;  %vm295_vm0 = vcmp.eq.s32.totalorder %v283_v9, 127  ;;  %vm286_vm1 = vcmp.eq.s32.totalorder %v283_v9, 0  ;;  %s496_s12 = sshll.u32 %s261_s11, 3 }
  0x21   : > { %s270_s6 = scalar_lea.vmem %s902_s0, %s497_s26  ;;  %s277_s30 = scalar_lea.vmem %s903_s1, %s497_s26 }
  0x22   : > { %v278_v2 = vld [vmem:[%s270_s6] sm:$0xff]  ;;  %s374_s22 = scalar_lea.hbm %s906_s4, %s503_s13  ;;  %s263_s24 = scalar_lea.vmem [#allocation7], %s496_s12 }
  0x23   : > { %v279_v3 = vmax.f32 %v278_v2, 0.0  ;;  %v280_v4 = vld [vmem:[%s277_s30] sm:$0xff]  ;;  %s376_s26 = sshll.u32 %s263_s24, 4  ;;  %s378_s29 = sshll.u32 %s374_s22, 4  ;;  %s377_s26 = int_to_ptr.vmem [resolvable:$true] %s376_s26  ;;  %s379_s29 = int_to_ptr.hbm [resolvable:$true] %s378_s29 }
  0x24   : > { %v281_v5 = vmax.f32 %v280_v4, 0.0  ;;  %s363_s5 = scalar_lea.sflag [#allocation4], %s261_s11  ;;  %s667_s6 = sshra.s32 %s379_s29, 4  ;;  %s668_s6 = int_to_ptr.hbm [resolvable:$true] %s667_s6 }
  0x25   : > { %284 = vrot.lane.b32.xlu1 %v279_v3, %s747_s9  ;;  %293 = vrot.lane.b32.xlu0 %v279_v3, %s748_s10  ;;  %s669_s7 = scalar_lea.hbm %s668_s6, 8  ;;  %s673_s30 = scalar_lea.hbm %s906_s4, 16 }
  0x26   : > { %p670_p1 = scmp.ne.s32.totalorder %s668_s6, %s669_s7  ;;  %p674_p5 = scmp.lt.s32.totalorder %s668_s6, %s906_s4 }
  0x27   : > { %p675_p6 = scmp.lt.s32.totalorder %s673_s30, %s669_s7 }
  0x28   : > { %p671_p2 = pnand %p670_p1, %p814_p4 }
  0x29   : > { %p676_p7 = por %p675_p6, %p674_p5 }
  0x2a   : > { %p672_p3 = pneg %p671_p2 }
  0x2c   : > { %p677_p9 = pnand %p676_p7, %p672_p3 }
  0x2d   : > { %289 = vperm.xlu1 %592, %v281_v5   ;;  %297 = vperm.xlu0 %591, %v281_v5  }
  0x97   : > { %v285_v7 = vpop.permute.xlu1 %284  ;;  %v294_v8 = vpop.permute.xlu0 %293 }
  0x9f   : > { %v298_v10 = vpop.permute.xlu0 %297  ;;  %v290_v12 = vpop.permute.xlu1 %289 }
  0xa0   : > { %v300_v11 = vsel %vm295_vm0, %v298_v10, %v294_v8  ;;  %v292_v15 = vsel %vm286_vm1, %v290_v12, %v285_v7 }
  0xa1   : > { %323 = vmatpush.msra.mxu0 %v300_v11  ;;  %506 = vmatpush.msra.mxu2 %v300_v11 }
  0xa3   : > { %324 = vmatpush.msra.mxu0 %v279_v3  ;;  %507 = vmatpush.msra.mxu2 %v279_v3 }
  0xa5   : > { %325 = vmatpush.msra.mxu0 %v292_v15  ;;  %508 = vmatpush.msra.mxu2 %v292_v15 }
  0xa6   : > { %500 = vmatmul.msk.f32.vlgmr.msra.gmra.mxu2 %vm303_vm2, %v302_v13  ;;  %499 = vmatmul.msk.f32.vlgmr.msra.gmra.mxu0 %vm303_vm2, %v301_v14 }
 0x123   : > { %v327_v16 = vpop.f32.mrf.mxu0 }
 0x124   : > { %v333_v19 = vmax.f32 %v327_v16, 0.0 }
 0x129   : > { %v330_v17 = vpop.f32.mrf.mxu2 }
 0x12a   : > { %v334_v18 = vmax.f32 %v330_v17, 0.0 }
 0x12c   : > { %354 = vmatpush.msra.mxu1 %v334_v18 }
 0x12e   : > { %355 = vmatpush.msra.mxu1 %v333_v19 }
 0x12f   : > { %501 = vmatmul.msk.f32.vlgmr.msra.gmra.mxu1 %vm336_vm3, %v335_v20 }
 0x1ac   : > { %v357_v21 = vpop.f32.mrf.mxu1 }
 0x1ad   : > { %v360_v22 = vadd.f32 %v357_v21, %v278_v2 }
 0x1af   : > { %361 = vst [vmem:[%s263_s24] sm:$0xff] %v360_v22 }
 0x1b0   : > { %680 = shalt.err (!%p677_p9)
}
 0x1b1   : > { %517 = dma.vmem_to_hbm [thread:$0]  (%p814_p4), %s377_s26, 128, %s379_s29, %s363_s5  }
 0x1b2 PF: > { %p534_p10 = scmp.ge.s32.totalorder %s739_s20, 2  ;;  %s390_s11 = sand.u32 1, %s719_s15  }
 0x1b3   : > { %s391_s12 = scalar_lea.sflag [#allocation4], %s390_s11 }
 0x1b4   : > { %p527_p11 = pnand %p534_p10, %p821_p8 }
 0x1b6   : > { %p528_p12 = pneg %p527_p11 }
 0x1b8   : > { %714 = dma.done.wait (%p528_p12), %s391_s12, 128  }
 0x1b9   : > { %716 = vsyncadd (%p528_p12), %s391_s12, 4294967168  ;;  %s19_s20 = sadd.s32 1, %s739_s20   ;;  %s911_s15 = smov %s723_s16 }
 0x1ba   : > { %p16_p13 = scmp.ge.s32.totalorder %s19_s20, 4   ;;  %s912_s16 = smov %s727_s17 }
 0x1bb   : > { %s913_s17 = smov %s827_s28  ;;  %s914_s18 = smov %s735_s19 }
 0x1bc   : > { %s915_s19 = smov %s917_s23  ;;  %18 = sbr.rel (!%p16_p13) target bundleno = 6 (0x6), region = 83 }
 0x1c1   :  { %397 = vsyncpa [#allocation3], 1 }
 0x1c2   :  { %399 = vsyncpa [#allocation3 + $0x1], 1 }
 0x1c3   :  { %400 = vsyncpa [#allocation6], 1 }
 0x1c4   :  { %401 = vsyncpa [#allocation4], 1 }
 0x1c5   :  { %403 = vsyncpa [#allocation4 + $0x1], 1 }

</bundles_post_ra>
